<compile_context>
chip_gen: v7x
topology: tpu7x:2x2x1
jax: 0.10.0
libtpu: 0.0.40
codegen_flags: <defaults>
</compile_context>

<pallas_src>
import math
import functools

import jax
import jax.numpy as jnp
from jax.experimental import pallas as pl
from jax.experimental.pallas import tpu as pltpu

_PI_TORCH = 3.14159265  # constant used verbatim in the PyTorch code


def _angle_linear_kernel(xlen_ref, x_ref, w_ref, cos_ref, phi_ref,
                         *, m, cos_thresholds, matmul_dtype):
    x = x_ref[...]                                   # (TM, D)  f32
    w = w_ref[...]                                   # (D, TN)  f32
    xlen = xlen_ref[...]                             # (TM, 1)  f32

    # Inverse row / column norms (tiny vectors -> cheap; divides stay off the
    # B x C elementwise path).  The renorm(2,1,1e-5).mul(1e5) of the weight is a
    # pure per-column rescale, which cancels in (x@ww)/||ww_col||, so the raw
    # column norm of w is all that is needed.
    inv_xlen = 1.0 / xlen                                                   # (TM, 1)
    inv_wlen = 1.0 / jnp.sqrt(jnp.sum(w * w, axis=0, keepdims=True))        # (1, TN)

    # MXU matmul (bf16 inputs by default, f32 accumulation).
    raw = jnp.dot(x.astype(matmul_dtype), w.astype(matmul_dtype),
                  preferred_element_type=jnp.float32)                       # (TM, TN)

    ct = jnp.clip(raw * (inv_xlen * inv_wlen), -1.0, 1.0)

    # cos(m*theta) via strength-reduced Chebyshev polynomials (Horner form).
    c2 = ct * ct
    if m == 0:
        cos_m_theta = jnp.ones_like(ct)
    elif m == 1:
        cos_m_theta = ct
    elif m == 2:
        cos_m_theta = 2.0 * c2 - 1.0
    elif m == 3:
        cos_m_theta = ct * (4.0 * c2 - 3.0)
    elif m == 4:
        cos_m_theta = 8.0 * c2 * (c2 - 1.0) + 1.0
    else:  # m == 5
        cos_m_theta = ct * (c2 * (16.0 * c2 - 20.0) + 5.0)

    # k = floor(m * arccos(ct) / PI_TORCH) without arccos:
    #   theta >= j*PI_TORCH/m  <=>  ct <= cos(j*PI_TORCH/m)  (cos decreasing on [0,pi])
    # so k counts the compile-time thresholds ct falls below; sign = (-1)^k.
    k = jnp.zeros_like(ct)
    sign = jnp.ones_like(ct)
    for t in cos_thresholds:
        below = ct <= t
        k = k + below.astype(jnp.float32)
        sign = jnp.where(below, -sign, sign)

    phi = sign * cos_m_theta - 2.0 * k

    cos_ref[...] = ct * xlen
    phi_ref[...] = phi * xlen


def angle_linear(x, w, *, m=4, block_b=256, block_c=1024,
                 matmul_dtype=jnp.bfloat16, vmem_limit_bytes=48 * 1024 * 1024):
    """Pallas forward of AngleLinear (phiflag=True). Returns (cos_theta, phi_theta).

    x: (B, in_features) f32, w: (in_features, out_features) f32 (raw PyTorch weight).
    """
    B, D = x.shape
    Dw, C = w.shape
    assert D == Dw
    assert 0 <= m <= 5

    # Tile sizes: full array dim if it fits, otherwise aligned to (8, 128).
    # Defaults (256, 1024) are sized for v7x's 64 MiB VMEM with double buffering;
    # v5e/v6e (128 MiB) can pass larger block_c.
    tm = B if B <= block_b else block_b
    tn = C if C <= block_c else block_c
    if tm != B and tm % 8 != 0:
        tm = max(8, (tm // 8) * 8)
    if tn != C and tn % 128 != 0:
        tn = max(128, (tn // 128) * 128)

    # Tiny (B, 1) row-norm precompute so it is not re-reduced for every C tile.
    xlen = jnp.sqrt(jnp.sum(x * x, axis=1, keepdims=True)).astype(jnp.float32)

    # Compile-time cosine thresholds cos(j * PI_TORCH / m), j = 1..m.
    cos_thresholds = tuple(float(math.cos(j * _PI_TORCH / m)) for j in range(1, m + 1))

    kernel = functools.partial(_angle_linear_kernel, m=m,
                               cos_thresholds=cos_thresholds,
                               matmul_dtype=matmul_dtype)

    grid = (pl.cdiv(B, tm), pl.cdiv(C, tn))
    out_shapes = (
        jax.ShapeDtypeStruct((B, C), jnp.float32),
        jax.ShapeDtypeStruct((B, C), jnp.float32),
    )
    return pl.pallas_call(
        kernel,
        out_shape=out_shapes,
        grid_spec=pltpu.PrefetchScalarGridSpec(
            num_scalar_prefetch=0,
            grid=grid,
            in_specs=[
                pl.BlockSpec((tm, 1), lambda i, j: (i, 0)),   # xlen
                pl.BlockSpec((tm, D), lambda i, j: (i, 0)),   # x     (full D per tile)
                pl.BlockSpec((D, tn), lambda i, j: (0, j)),   # w     (full D per tile)
            ],
            out_specs=(
                pl.BlockSpec((tm, tn), lambda i, j: (i, j)),  # cos_theta
                pl.BlockSpec((tm, tn), lambda i, j: (i, j)),  # phi_theta
            ),
        ),
        compiler_params=pltpu.CompilerParams(
            dimension_semantics=("parallel", "parallel"),
            vmem_limit_bytes=vmem_limit_bytes,
        ),
    )(xlen, x, w)


def _init_weight(key, in_features, out_features):
    """Deterministic replica of the PyTorch __init__:
    uniform_(-1, 1).renorm_(2, 1, 1e-5).mul_(1e5)."""
    w = jax.random.uniform(key, (in_features, out_features),
                           dtype=jnp.float32, minval=-1.0, maxval=1.0)
    col_norm = jnp.sqrt(jnp.sum(w * w, axis=0, keepdims=True))
    factor = jnp.where(col_norm > 1e-5, 1e-5 / (col_norm + 1e-7), 1.0)
    return w * factor * 1e5


def _reference(x, w, m=4):
    """Pure-JAX reference mirroring the PyTorch forward (phiflag=True)."""
    col_norm = jnp.sqrt(jnp.sum(w * w, axis=0, keepdims=True))
    factor = jnp.where(col_norm > 1e-5, 1e-5 / (col_norm + 1e-7), 1.0)
    ww = w * factor * 1e5
    xlen = jnp.sqrt(jnp.sum(x * x, axis=1, keepdims=True))
    wlen = jnp.sqrt(jnp.sum(ww * ww, axis=0, keepdims=True))
    ct = jnp.clip((x @ ww) / xlen / wlen, -1.0, 1.0)
    mlambda = [
        lambda c: jnp.ones_like(c),
        lambda c: c,
        lambda c: 2.0 * c ** 2 - 1.0,
        lambda c: 4.0 * c ** 3 - 3.0 * c,
        lambda c: 8.0 * c ** 4 - 8.0 * c ** 2 + 1.0,
        lambda c: 16.0 * c ** 5 - 20.0 * c ** 3 + 5.0 * c,
    ]
    cos_m_theta = mlambda[m](ct)
    theta = jnp.arccos(ct)
    k = jnp.floor(m * theta / _PI_TORCH)
    sign = 1.0 - 2.0 * jnp.mod(k, 2.0)
    phi = sign * cos_m_theta - 2.0 * k
    return ct * xlen, phi * xlen


if __name__ == "__main__":
    # Small shapes; block_b=8, block_c=128 forces a (2, 2) grid so the tiled
    # path (multiple i and j tiles) is actually exercised.
    B, IN, OUT = 16, 64, 256
    key = jax.random.PRNGKey(0)
    kx, kw = jax.random.split(key)
    x = jax.random.normal(kx, (B, IN), dtype=jnp.float32)
    w = _init_weight(kw, IN, OUT)

    ref_cos, ref_phi = _reference(x, w, m=4)

    # 1) f32-matmul path: strict check against the PyTorch-faithful reference.
    cos_f32, phi_f32 = jax.block_until_ready(
        angle_linear(x, w, m=4, block_b=8, block_c=128, matmul_dtype=jnp.float32))
    assert jnp.allclose(cos_f32, ref_cos, atol=1e-4, rtol=1e-4)
    assert jnp.allclose(phi_f32, ref_phi, atol=1e-4, rtol=1e-4)

    # 2) default bf16-MXU path: magnitude-normalized sanity check
    #    (bf16 input quantization is ~2^-9 relative).
    cos_bf, phi_bf = jax.block_until_ready(
        angle_linear(x, w, m=4, block_b=8, block_c=128))
    assert jnp.max(jnp.abs(cos_bf - ref_cos)) <= 0.05 * jnp.max(jnp.abs(ref_cos)) + 1e-3
    assert jnp.max(jnp.abs(phi_bf - ref_phi)) <= 0.05 * jnp.max(jnp.abs(ref_phi)) + 1e-3

    print("KERNEL_OK")
</pallas_src>

<mosaic_0001>
module attributes {stable_mosaic.version = 11 : i64} {
  func.func @_angle_linear_kernel(%arg0: i32, %arg1: i32, %arg2: memref<8x1xf32, #tpu.memory_space<vmem>>, %arg3: memref<8x64xf32, #tpu.memory_space<vmem>>, %arg4: memref<64x128xf32, #tpu.memory_space<vmem>>, %arg5: memref<8x128xf32, #tpu.memory_space<vmem>>, %arg6: memref<8x128xf32, #tpu.memory_space<vmem>>) attributes {dimension_semantics = [#tpu.dimension_semantics<parallel>, #tpu.dimension_semantics<parallel>], iteration_bounds = array<i64: 2, 2>, scalar_prefetch = 0 : i64, scratch_operands = 0 : i64, tpu.core_type = #tpu.core_type<tc>, window_params = [{transform_indices = @transform_0, window_bounds = array<i64: 8, 1>}, {transform_indices = @transform_1, window_bounds = array<i64: 8, 64>}, {transform_indices = @transform_2, window_bounds = array<i64: 64, 128>}, {transform_indices = @transform_3, window_bounds = array<i64: 8, 128>}, {transform_indices = @transform_4, window_bounds = array<i64: 8, 128>}]} {
    %c0 = arith.constant 0 : index
    %c0_0 = arith.constant 0 : index
    %0 = vector.load %arg3[%c0, %c0_0] : memref<8x64xf32, #tpu.memory_space<vmem>>, vector<8x64xf32>
    %c0_1 = arith.constant 0 : index
    %c0_2 = arith.constant 0 : index
    %1 = vector.load %arg4[%c0_1, %c0_2] : memref<64x128xf32, #tpu.memory_space<vmem>>, vector<64x128xf32>
    %c0_3 = arith.constant 0 : index
    %c0_4 = arith.constant 0 : index
    %2 = vector.load %arg2[%c0_3, %c0_4] : memref<8x1xf32, #tpu.memory_space<vmem>>, vector<8x1xf32>
    %cst = arith.constant 1.000000e+00 : f32
    %3 = vector.broadcast %cst : f32 to vector<8x1xf32>
    %4 = arith.divf %3, %2 : vector<8x1xf32>
    %5 = arith.mulf %1, %1 : vector<64x128xf32>
    %cst_5 = arith.constant dense<0.000000e+00> : vector<128xf32>
    %6 = vector.multi_reduction <add>, %5, %cst_5 [0] : vector<64x128xf32> to vector<128xf32>
    %7 = vector.shape_cast %6 : vector<128xf32> to vector<1x128xf32>
    %8 = math.sqrt %7 : vector<1x128xf32>
    %cst_6 = arith.constant 1.000000e+00 : f32
    %9 = vector.broadcast %cst_6 : f32 to vector<1x128xf32>
    %10 = arith.divf %9, %8 : vector<1x128xf32>
    %cst_7 = arith.constant dense<0.000000e+00> : vector<8x128xf32>
    %11 = tpu.matmul %0, %1, %cst_7 {dimension_numbers = #tpu.dot_dimension_numbers<[1], [0], [0], [1], [0, 0, 1, 1], [], []>} : vector<8x64xf32>, vector<64x128xf32>, vector<8x128xf32> -> vector<8x128xf32>
    %12 = vector.broadcast %4 : vector<8x1xf32> to vector<8x128xf32>
    %13 = vector.broadcast %10 : vector<1x128xf32> to vector<8x128xf32>
    %14 = arith.mulf %12, %13 : vector<8x128xf32>
    %15 = arith.mulf %11, %14 : vector<8x128xf32>
    %cst_8 = arith.constant -1.000000e+00 : f32
    %cst_9 = arith.constant 1.000000e+00 : f32
    %16 = vector.broadcast %cst_8 : f32 to vector<8x128xf32>
    %17 = arith.maximumf %16, %15 : vector<8x128xf32>
    %18 = vector.broadcast %cst_9 : f32 to vector<8x128xf32>
    %19 = arith.minimumf %18, %17 : vector<8x128xf32>
    %20 = arith.mulf %19, %19 : vector<8x128xf32>
    %cst_10 = arith.constant 8.000000e+00 : f32
    %21 = vector.broadcast %cst_10 : f32 to vector<8x128xf32>
    %22 = arith.mulf %21, %20 : vector<8x128xf32>
    %cst_11 = arith.constant 1.000000e+00 : f32
    %23 = vector.broadcast %cst_11 : f32 to vector<8x128xf32>
    %24 = arith.subf %20, %23 : vector<8x128xf32>
    %25 = arith.mulf %22, %24 : vector<8x128xf32>
    %cst_12 = arith.constant 1.000000e+00 : f32
    %26 = vector.broadcast %cst_12 : f32 to vector<8x128xf32>
    %27 = arith.addf %25, %26 : vector<8x128xf32>
    %cst_13 = arith.constant 0.000000e+00 : f32
    %28 = vector.broadcast %cst_13 : f32 to vector<8x128xf32>
    %cst_14 = arith.constant 1.000000e+00 : f32
    %29 = vector.broadcast %cst_14 : f32 to vector<8x128xf32>
    %cst_15 = arith.constant 0.707106769 : f32
    %30 = vector.broadcast %cst_15 : f32 to vector<8x128xf32>
    %31 = arith.cmpf ole, %19, %30 : vector<8x128xf32>
    %32 = arith.extui %31 : vector<8x128xi1> to vector<8x128xi32>
    %33 = arith.sitofp %32 : vector<8x128xi32> to vector<8x128xf32>
    %34 = arith.addf %28, %33 : vector<8x128xf32>
    %cst_16 = arith.constant 0.000000e+00 : f32
    %35 = vector.broadcast %cst_16 : f32 to vector<8x128xf32>
    %36 = arith.subf %35, %29 : vector<8x128xf32>
    %37 = arith.select %31, %36, %29 : vector<8x128xi1>, vector<8x128xf32>
    %cst_17 = arith.constant 1.79489656E-9 : f32
    %38 = vector.broadcast %cst_17 : f32 to vector<8x128xf32>
    %39 = arith.cmpf ole, %19, %38 : vector<8x128xf32>
    %40 = arith.extui %39 : vector<8x128xi1> to vector<8x128xi32>
    %41 = arith.sitofp %40 : vector<8x128xi32> to vector<8x128xf32>
    %42 = arith.addf %34, %41 : vector<8x128xf32>
    %cst_18 = arith.constant 0.000000e+00 : f32
    %43 = vector.broadcast %cst_18 : f32 to vector<8x128xf32>
    %44 = arith.subf %43, %37 : vector<8x128xf32>
    %45 = arith.select %39, %44, %37 : vector<8x128xi1>, vector<8x128xf32>
    %cst_19 = arith.constant -0.707106769 : f32
    %46 = vector.broadcast %cst_19 : f32 to vector<8x128xf32>
    %47 = arith.cmpf ole, %19, %46 : vector<8x128xf32>
    %48 = arith.extui %47 : vector<8x128xi1> to vector<8x128xi32>
    %49 = arith.sitofp %48 : vector<8x128xi32> to vector<8x128xf32>
    %50 = arith.addf %42, %49 : vector<8x128xf32>
    %cst_20 = arith.constant 0.000000e+00 : f32
    %51 = vector.broadcast %cst_20 : f32 to vector<8x128xf32>
    %52 = arith.subf %51, %45 : vector<8x128xf32>
    %53 = arith.select %47, %52, %45 : vector<8x128xi1>, vector<8x128xf32>
    %cst_21 = arith.constant -1.000000e+00 : f32
    %54 = vector.broadcast %cst_21 : f32 to vector<8x128xf32>
    %55 = arith.cmpf ole, %19, %54 : vector<8x128xf32>
    %56 = arith.extui %55 : vector<8x128xi1> to vector<8x128xi32>
    %57 = arith.sitofp %56 : vector<8x128xi32> to vector<8x128xf32>
    %58 = arith.addf %50, %57 : vector<8x128xf32>
    %cst_22 = arith.constant 0.000000e+00 : f32
    %59 = vector.broadcast %cst_22 : f32 to vector<8x128xf32>
    %60 = arith.subf %59, %53 : vector<8x128xf32>
    %61 = arith.select %55, %60, %53 : vector<8x128xi1>, vector<8x128xf32>
    %62 = arith.mulf %61, %27 : vector<8x128xf32>
    %cst_23 = arith.constant 2.000000e+00 : f32
    %63 = vector.broadcast %cst_23 : f32 to vector<8x128xf32>
    %64 = arith.mulf %63, %58 : vector<8x128xf32>
    %65 = arith.subf %62, %64 : vector<8x128xf32>
    %66 = vector.broadcast %2 : vector<8x1xf32> to vector<8x128xf32>
    %67 = arith.mulf %19, %66 : vector<8x128xf32>
    %c0_24 = arith.constant 0 : index
    %c0_25 = arith.constant 0 : index
    %68 = vector.load %arg5[%c0_24, %c0_25] : memref<8x128xf32, #tpu.memory_space<vmem>>, vector<8x128xf32>
    tpu.vector_store %arg5[%c0_24, %c0_25], %67 {strides = array<i32>} : memref<8x128xf32, #tpu.memory_space<vmem>>, vector<8x128xf32>,
    %69 = vector.broadcast %2 : vector<8x1xf32> to vector<8x128xf32>
    %70 = arith.mulf %65, %69 : vector<8x128xf32>
    %c0_26 = arith.constant 0 : index
    %c0_27 = arith.constant 0 : index
    %71 = vector.load %arg6[%c0_26, %c0_27] : memref<8x128xf32, #tpu.memory_space<vmem>>, vector<8x128xf32>
    tpu.vector_store %arg6[%c0_26, %c0_27], %70 {strides = array<i32>} : memref<8x128xf32, #tpu.memory_space<vmem>>, vector<8x128xf32>,
    return
  }
  func.func @transform_0(%arg0: i32, %arg1: i32) -> (i32, i32) {
    %c0_i32 = arith.constant 0 : i32
    %c0_i32_0 = arith.constant 0 : i32
    return %arg0, %c0_i32 : i32, i32
  }
  func.func @transform_1(%arg0: i32, %arg1: i32) -> (i32, i32) {
    %c0_i32 = arith.constant 0 : i32
    %c0_i32_0 = arith.constant 0 : i32
    return %arg0, %c0_i32 : i32, i32
  }
  func.func @transform_2(%arg0: i32, %arg1: i32) -> (i32, i32) {
    %c0_i32 = arith.constant 0 : i32
    %c0_i32_0 = arith.constant 0 : i32
    return %c0_i32, %arg1 : i32, i32
  }
  func.func @transform_3(%arg0: i32, %arg1: i32) -> (i32, i32) {
    %c0_i32 = arith.constant 0 : i32
    return %arg0, %arg1 : i32, i32
  }
  func.func @transform_4(%arg0: i32, %arg1: i32) -> (i32, i32) {
    %c0_i32 = arith.constant 0 : i32
    return %arg0, %arg1 : i32, i32
  }
}

</mosaic_0001>

<bundles_post_ra>
// kernel: tpu_custom_call.1
= control target key start
LH: loop header
LB: loop body
LE: loop exit
PB: predicated region body
PF: predicated region fallthrough
CT: control target
= control target key end

     0   :  { %10 = vsyncpa [#allocation3], 0  ;;  %s1324_s0 = inlined_call_operand.vmem [shape: f32[16,1], index: 0, kind: input, shape index: {}]   ;;  %s1325_s1 = inlined_call_operand.vmem [shape: f32[16,64], index: 1, kind: input, shape index: {}]   ;;  %s1326_s2 = inlined_call_operand.hbm [shape: f32[64,256], index: 2, kind: input, shape index: {}]   ;;  %s1327_s3 = inlined_call_operand.hbm [shape: f32[16,256], index: 3, kind: output, shape index: {0}]   ;;  %s1328_s4 = inlined_call_operand.hbm [shape: f32[16,256], index: 4, kind: output, shape index: {1}]  }
   0x1   :  { %12 = vsyncpa [#allocation3 + $0x1], 0 }
   0x2   :  { %13 = vsyncpa [#allocation4], 0 }
   0x3   :  { %15 = vsyncpa [#allocation4 + $0x1], 0 }
   0x4   :  { %16 = vsyncpa [#allocation7], 0 }
   0x5   :  { %18 = vsyncpa [#allocation7 + $0x1], 0  ;;  %s1029_s15 = smov 0   ;;  %s1031_s16 = smov 0  }
   0x6   :  { %s1033_s17 = smov 0   ;;  %s1035_s18 = smov 0  }
   0x7   :  { %s1037_s19 = smov 0   ;;  %s1039_s20 = smov 0  }
   0x8   :  { %s1041_s21 = smov 0   ;;  %s1043_s22 = smov 0  }
   0x9   :  { %s1045_s23 = smov 0   ;;  %s1047_s24 = smov 0  }
   0xa   :  { %s1049_s25 = smov 0  }
   0xb LB: > { %s618_s26 = sadd.s32 4294967295, %s991_s25   ;;  %s619_s27 = sadd.s32 4294967294, %s991_s25   ;;  %s991_s25 = sphi %s1049_s25, %s24_s25   ;;  %s987_s24 = sphi %s1047_s24, %s1354_s24   ;;  %s983_s23 = sphi %s1045_s23, %s1353_s23   ;;  %s979_s22 = sphi %s1043_s22, %s1352_s22   ;;  %s975_s21 = sphi %s1041_s21, %s1351_s21   ;;  %s971_s20 = sphi %s1039_s20, %s1350_s20   ;;  %s967_s19 = sphi %s1037_s19, %s1349_s19   ;;  %s963_s18 = sphi %s1035_s18, %s1348_s18   ;;  %s959_s17 = sphi %s1033_s17, %s1347_s17   ;;  %s955_s16 = sphi %s1031_s16, %s1346_s16   ;;  %s951_s15 = sphi %s1029_s15, %s1345_s15  }
   0xc   : > { %s33_s28 = sadd.s32 1, %s983_s23  ;;  %s36_s29 = sadd.s32 1, %s987_s24 }
   0xd   : > { %p34_p0 = scmp.ge.s32.totalorder %s33_s28, 2  ;;  %s95_s30 = sadd.s32 1, %s971_s20 }
   0xe   : > { %p102_p1 = scmp.ne.s32.totalorder %s971_s20, %s967_s19  ;;  %p103_p2 = scmp.eq.s32.totalorder %s991_s25, 0 }
   0xf   : > { %s1356_s28 = smov (%p34_p0, %s33_s28), 0  ;;  %s1358_s29 = smov (!%p34_p0, %s36_s29), %s987_s24 }
  0x10   : > { %1333 = sst [smem:[#allocation11_spill]] %s1356_s28  ;;  %s92_s5 = ssub.s32 %s983_s23, %s1356_s28 }
  0x11   : > { %p1095_p3 = por %p103_p2, %p102_p1  ;;  %p38_p4 = scmp.ge.s32.totalorder %s1358_s29, 2 }
  0x12   : > { %p93_p5 = scmp.eq.s32.totalorder %s92_s5, 0  ;;  %p108_p6 = scmp.ne.s32.totalorder %s967_s19, %s963_s18 }
  0x13   : > { %p109_p7 = scmp.eq.s32.totalorder %s618_s26, 0  ;;  %s1360_s29 = smov (%p38_p4, %s1358_s29), 0 }
  0x14   : > { %1335 = sst [smem:[#allocation12_spill]] %s1360_s29  ;;  %s118_s9 = ssub.s32 %s987_s24, %s1360_s29 }
  0x15   : > { %s1103_s7 = scalar_select %p93_p5, %s971_s20, %s95_s30  }
  0x16   : > { %p1105_p8 = por %p109_p7, %p108_p6  ;;  %s120_s10 = sor.u32 %s118_s9, %s92_s5 }
  0x17   : > { %s123_s11 = sadd.s32 1, %s959_s17  ;;  %p121_p9 = scmp.eq.s32.totalorder %s120_s10, 0 }
  0x18   : > { %p133_p10 = scmp.ne.s32.totalorder %s959_s17, %s955_s16  ;;  %p134_p11 = scmp.eq.s32.totalorder %s618_s26, 3 }
  0x19   : > { %p139_p12 = scmp.ne.s32.totalorder %s955_s16, %s951_s15  ;;  %p140_p0 = scmp.eq.s32.totalorder %s619_s27, 3 }
  0x1a   : > { %s1117_s12 = scalar_select %p121_p9, %s959_s17, %s123_s11  }
  0x1b   : > { %p1119_p13 = por %p134_p11, %p133_p10  ;;  %p702_p1 = scmp.lt.s32.totalorder %s991_s25, 4 }
  0x1c   : > { %p1124_p2 = por %p140_p0, %p139_p12  ;;  %s202_s18 = sand.u32 1, %s971_s20  }
  0x1d   : > { %s1337_s13 = scalar_select %p1119_p13, 1, 0 }
  0x1e   : > { %s1338_s14 = scalar_select %p1124_p2, 1, 0 }
  0x1f   : > { %s622_s30 = sshll.u32 %s202_s18, 6  ;;  %s623_s5 = sshll.u32 %s983_s23, 7 }
  0x20   : > { %s1133_s26 = scalar_lea.hbm %s1326_s2, %s623_s5  ;;  %s206_s11 = scalar_lea.vmem [#allocation2], %s622_s30 }
  0x21   : > { %s212_s29 = sshll.u32 %s206_s11, 4  ;;  %p1139_p4 = pnand %p702_p1, %p1095_p3  ;;  %s1135_s29 = int_to_ptr.vmem [resolvable:$true] %s212_s29 }
  0x22   : > { %s1143_s28 = scalar_lea.sflag [#allocation3], %s202_s18  ;;  %s807_s9 = scalar_lea.hbm %s1133_s26, 1024 }
  0x23   : > { %p808_p5 = scmp.ne.s32.totalorder %s1133_s26, %s807_s9  ;;  %p809_p6 = pneg %p1139_p4 }
  0x24   : > { %s812_s6 = scalar_lea.hbm %s1326_s2, 2048  ;;  %p813_p3 = scmp.lt.u32.totalorder %s1133_s26, %s1326_s2 }
  0x25   : > { %p810_p7 = pnand %p809_p6, %p808_p5  ;;  %p814_p10 = scmp.lt.u32.totalorder %s812_s6, %s807_s9 }
  0x26   : > { %p816_p12 = scmp.lt.u32.totalorder %s807_s9, %s1133_s26 }
  0x27   : > { %p811_p9 = pneg %p810_p7  ;;  %p815_p11 = por %p814_p10, %p813_p3 }
  0x29   : > { %p817_p0 = por %p816_p12, %p815_p11 }
  0x2b   : > { %p818_p1 = pnand %p817_p0, %p811_p9 }
  0x2d   : > { %821 = shalt.err (!%p818_p1)
}
  0x2e   : > { %s822_s18 = scalar_lea.vmem %s1135_s29, 1024  ;;  %s993_s30 = smov [#allocation2]  }
  0x2f   : > { %p823_p5 = scmp.ne.s32.totalorder %s1135_s29, %s822_s18  ;;  %s827_s5 = sshll.u32 %s993_s30, 4  ;;  %s828_s5 = int_to_ptr.vmem [resolvable:$false] %s827_s5 }
  0x30   : > { %s829_s10 = scalar_lea.vmem %s828_s5, 2048  ;;  %p830_p13 = scmp.lt.s32.totalorder %s1135_s29, %s828_s5 }
  0x31   : > { %p825_p7 = pnand %p823_p5, %p809_p6  ;;  %p831_p3 = scmp.lt.s32.totalorder %s829_s10, %s822_s18 }
  0x33   : > { %p826_p2 = pneg %p825_p7  ;;  %p832_p10 = por %p831_p3, %p830_p13 }
  0x35   : > { %p833_p11 = pnand %p832_p10, %p826_p2 }
  0x37   : > { %836 = shalt.err (!%p833_p11)
}
  0x38   : > { %s994_s9 = smov 256   ;;  %s995_s6 = smov 128  }
  0x39   : > { %s996_s11 = smov 8   ;;  %p624_p6 = scmp.ge.s32.totalorder %s991_s25, 1 }
  0x3a   : > { %694 = dma.hbm_to_vmem [thread:$0]  (!%p1139_p4), %s1133_s26, 1024, %s1135_s29, %s1143_s28, %s994_s9, %s995_s6, %s996_s11  }
  0x3b   : > { %p220_p9 = scmp.lt.s32.totalorder %s991_s25, 5 }
  0x3d   : > { %p221_p12 = pnand %p624_p6, %p220_p9 }
  0x3e   : > { %s226_s18 = sand.u32 (!%p221_p12), 1, %s967_s19  }
  0x3f   : > { %224 = sbr.rel (%p221_p12) target bundleno = 348 (0x15c), region = 32  ;;  %s625_s30 = sshll.u32 (!%p221_p12), %s226_s18, 6 }
  0x40   : > { %s227_s5 = scalar_lea.sflag (!%p221_p12), [#allocation3], %s226_s18  ;;  %s1174_s10 = scalar_lea.vmem (!%p221_p12), [#allocation2], %s625_s30 }
  0x46   : > { %938 = dma.done.wait (%p1105_p8), %s227_s5, 1024  }
  0x47   : > { %940 = vsyncadd (%p1105_p8), %s227_s5, 4294966272  ;;  %p268_p13 = scmp.lt.s32.totalorder %s979_s22, 1  ;;  %v997_v0 = vmov 0.0|0.0   ;;  %vm998_vm0 = vmmov 0   ;;  %v999_v1 = vmov 0.0   ;;  %v1000_v2 = vmov 0  }
  0x48   : > { %673 = vmatprep.subr.bf16.mxu0 %v997_v0  ;;  %670 = vmatprep.mubr.msk.f32.mxu0 %vm998_vm0, %v999_v1  ;;  %v277_v3 = vld [vmem:[%s1174_s10] sm:$0xff]  ;;  %v278_v4 = vld [vmem:[%s1174_s10 + $0x8] sm:$0xff]  ;;  %v279_v5 = vld [vmem:[%s1174_s10 + $0x10] sm:$0xff]  ;;  %vm318_vm1 = vcmask 523264   ;;  %s1205_s18 = sand.u32 1, %s955_s16   ;;  %s639_s30 = sshll.u32 %s979_s22, 1 }
  0x49   : > { %s1183_s28 = scalar_select %p268_p13, %s979_s22, 1  ;;  %800 = vset.pattern.permute.xlu0 %v1000_v2  ;;  %v288_v6 = vmul.f32 %v277_v3, %v277_v3  ;;  %v289_v7 = vmul.f32 %v278_v4, %v278_v4  ;;  %v674_v8 = vpack.c.bf16 %v278_v4, %v277_v3  ;;  %v280_v9 = vld [vmem:[%s1174_s10 + $0x18] sm:$0xff]  ;;  %v290_v10 = vmul.f32 %v279_v5, %v279_v5  ;;  %v281_v15 = vld [vmem:[%s1174_s10 + $0x20] sm:$0xff]  ;;  %v282_v16 = vld [vmem:[%s1174_s10 + $0x28] sm:$0xff] }
  0x4a   : > { %v291_v12 = vmul.f32 %v280_v9, %v280_v9  ;;  %v677_v13 = vpack.c.bf16 %v280_v9, %v279_v5  ;;  %v292_v18 = vmul.f32 %v281_v15, %v281_v15  ;;  %v293_v20 = vmul.f32 %v282_v16, %v282_v16  ;;  %v283_v22 = vld [vmem:[%s1174_s10 + $0x30] sm:$0xff]  ;;  %v284_v23 = vld [vmem:[%s1174_s10 + $0x38] sm:$0xff]  ;;  %s626_s5 = sshll.u32 %s1205_s18, 3  ;;  %s1210_s10 = sadd.s32 %s975_s21, %s639_s30 }
  0x4b   : > { %s628_s29 = sshll.u32 %s1183_s28, 3  ;;  %v296_v11 = vadd.f32 %v289_v7, %v288_v6  ;;  %675 = vmatpush3.bf16.msra.mxu0 %v674_v8  ;;  %v680_v21 = vpack.c.bf16 %v282_v16, %v281_v15  ;;  %v294_v25 = vmul.f32 %v283_v22, %v283_v22  ;;  %v295_v27 = vmul.f32 %v284_v23, %v284_v23  ;;  %s1332_s28 = sshll.u32 %s1210_s10, 7 }
  0x4c   : > { %s271_s27 = scalar_lea.vmem %s1324_s0, %s628_s29  ;;  %676 = vmatprep.subr.bf16.mxu0 %v997_v0  ;;  %v683_v28 = vpack.c.bf16 %v284_v23, %v283_v22  ;;  %s275_s11 = scalar_lea.vmem %s1325_s1, %s628_s29  ;;  %v1001_v54 = vmov 1.0  }
  0x4d   : > { %v285_v14 = vld [vmem:[%s271_s27] sm:$0xff]  ;;  %v297_v17 = vadd.f32 %v296_v11, %v290_v10  ;;  %s260_s29 = scalar_lea.vmem [#allocation5], %s626_s5  ;;  %s1220_s26 = scalar_lea.hbm %s1327_s3, %s1332_s28 }
  0x4e   : > { %801 = vrcp.f32 %v285_v14  ;;  %v276_v32 = vld [vmem:[%s275_s11] sm:$0xff]  ;;  %s462_s8 = sshll.u32 %s260_s29, 4  ;;  %s442_s27 = scalar_lea.sflag [#allocation4], %s1205_s18  ;;  %s1222_s8 = int_to_ptr.vmem [resolvable:$true] %s462_s8 }
  0x4f   : > { %v298_v19 = vadd.f32 %v297_v17, %v291_v12  ;;  %678 = vmatpush3.bf16.msra.mxu0 %v677_v13  ;;  %s837_s9 = scalar_lea.vmem %s1222_s8, 128  ;;  %p1340_p2 = scmp.ne.s32.totalorder %s1337_s13, 0 }
  0x50   : > { %679 = vmatprep.subr.bf16.mxu0 %v997_v0  ;;  %p838_p8 = scmp.ne.s32.totalorder %s1222_s8, %s837_s9  ;;  %s1002_s6 = smov [#allocation5]  }
  0x51   : > { %v299_v24 = vadd.f32 %v298_v19, %v292_v18  ;;  %s841_s11 = sshll.u32 %s1002_s6, 4  ;;  %s842_s11 = int_to_ptr.vmem [resolvable:$false] %s841_s11 }
  0x52   : > { %p839_p4 = pnand %p838_p8, %p1340_p2  ;;  %s843_s30 = scalar_lea.vmem %s842_s11, 256 }
  0x53   : > { %v300_v26 = vadd.f32 %v299_v24, %v293_v20  ;;  %681 = vmatpush3.bf16.msra.mxu0 %v680_v21  ;;  %p844_p1 = scmp.lt.s32.totalorder %s1222_s8, %s842_s11  ;;  %p845_p5 = scmp.lt.s32.totalorder %s843_s30, %s837_s9 }
  0x54   : > { %682 = vmatprep.subr.bf16.mxu0 %v997_v0  ;;  %p840_p0 = pneg %p839_p4 }
  0x55   : > { %v301_v29 = vadd.f32 %v300_v26, %v294_v25  ;;  %p846_p7 = por %p845_p5, %p844_p1 }
  0x57   : > { %v302_v31 = vadd.f32 %v301_v29, %v295_v27  ;;  %684 = vmatpush3.bf16.msra.mxu0 %v683_v28  ;;  %p847_p3 = pnand %p846_p7, %p840_p0 }
  0x58   : > { %v802_v30 = vpop.eup %801 }
  0x59   : > { %394 = vperm.xlu0 %800, %v802_v30   ;;  %v303_v33 = vrot.slane %v302_v31, 4 }
  0x5a   : > { %671 = vmatmul.mubr.msk.f32.vlgmr.msra.gmra.mrb[0].mxu0 %vm318_vm1, %v276_v32 }
  0x5b   : > { %v304_v34 = vadd.f32 %v303_v33, %v302_v31 }
  0x5d   : > { %434 = vperm.xlu0 %800, %v285_v14   ;;  %v305_v35 = vrot.slane %v304_v34, 2 }
  0x5f   : > { %v306_v36 = vadd.f32 %v305_v35, %v304_v34 }
  0x61   : > { %v307_v37 = vrot.slane %v306_v36, 1 }
  0x63   : > { %v308_v38 = vadd.f32 %v307_v37, %v306_v36 }
  0x65   : > { %803 = vrsqrt.f32 %v308_v38  ;;  %vm311_vm2 = vcmp.eq.f32.partialorder %v308_v38, inf  ;;  %v314_v41 = vand.u32 2147483648, %v308_v38  ;;  %vm313_vm3 = vcmp.eq.f32.partialorder %v308_v38, 0.0 }
  0x6f   : > { %v804_v39 = vpop.eup %803 }
  0x70   : > { %v310_v40 = vmul.f32 %v804_v39, %v308_v38 }
  0x72   : > { %v312_v42 = vsel %vm311_vm2, %v308_v38, %v310_v40 }
  0x73   : > { %v315_v43 = vsel %vm313_vm3, %v314_v41, %v312_v42 }
  0x74   : > { %805 = vrcp.f32 %v315_v43 }
  0x7e   : > { %v806_v44 = vpop.eup %805 }
  0xd8   : > { %v395_v45 = vpop.permute.xlu0 %394 }
  0xd9   : > { %v397_v46 = vmul.f32 %v806_v44, %v395_v45 }
  0xdc   : > { %v435_v51 = vpop.permute.xlu0 %434 }
 0x12d   : > { %v388_v47 = vpop.f32.mrb[0].mxu0 }
 0x12e   : > { %v398_v48 = vmul.f32 %v397_v46, %v388_v47  ;;  %v672_v49 = vpop.f32.mrb[1].mxu0 }
 0x130   : > { %v631_v50 = vclamps-f32 %v398_v48, 1.0 }
 0x132   : > { %v401_v52 = vmul.f32 %v631_v50, %v631_v50  ;;  %vm406_vm4 = vcmp.le.f32.partialorder %v631_v50, 0.70710677  ;;  %vm411_vm5 = vcmp.le.f32.partialorder %v631_v50, 1.7948966e-09  ;;  %v437_v53 = vmul.f32 %v631_v50, %v435_v51 }
 0x133   : > { %v410_v55 = vsel %vm406_vm4, -1.0, %v1001_v54  ;;  %v633_v56 = vsel %vm406_vm4, 1.0, %v999_v1  ;;  %v634_v57 = vsel %vm411_vm5, 1.0, %v999_v1  ;;  %vm417_vm6 = vcmp.le.f32.partialorder %v631_v50, -0.70710677 }
 0x134   : > { %v415_v58 = vsub.f32 0.0, %v410_v55  ;;  %438 = vst [vmem:[%s260_s29] sm:$0xff] %v437_v53  ;;  %v402_v59 = vmul.f32 8.0, %v401_v52  ;;  %v632_v60 = vadd.f32 -1.0, %v401_v52  ;;  %v414_v61 = vadd.f32 %v634_v57, %v633_v56 }
 0x135   : > { %850 = shalt.err (!%p847_p3)
}
 0x136   : > { %s851_s29 = scalar_lea.hbm %s1220_s26, 128  ;;  %s855_s6 = scalar_lea.hbm %s1327_s3, 512 }
 0x137   : > { %p852_p10 = scmp.ne.s32.totalorder %s1220_s26, %s851_s29  ;;  %p856_p9 = scmp.lt.u32.totalorder %s1220_s26, %s1327_s3 }
 0x138   : > { %p857_p12 = scmp.lt.u32.totalorder %s855_s6, %s851_s29  ;;  %p859_p8 = scmp.lt.u32.totalorder %s851_s29, %s1220_s26 }
 0x139   : > { %p853_p11 = pnand %p852_p10, %p1340_p2 }
 0x13a   : > { %p858_p13 = por %p857_p12, %p856_p9 }
 0x13b   : > { %p854_p6 = pneg %p853_p11 }
 0x13c   : > { %p860_p4 = por %p859_p8, %p858_p13 }
 0x13e   : > { %p861_p0 = pnand %p860_p4, %p854_p6 }
 0x140   : > { %864 = shalt.err (!%p861_p0)
}
 0x141   : > { %687 = dma.vmem_to_hbm [thread:$0]  (%p1340_p2), %s1222_s8, 128, %s1220_s26, %s442_s27   ;;  %v635_v62 = vsel %vm417_vm6, 1.0, %v999_v1  ;;  %vm423_vm7 = vcmp.le.f32.partialorder %v631_v50, -1.0  ;;  %v416_v63 = vsel %vm411_vm5, %v415_v58, %v410_v55  ;;  %v404_v2 = vmul.f32 %v632_v60, %v402_v59 }
 0x142   : > { %v420_v0 = vadd.f32 %v635_v62, %v414_v61  ;;  %v421_v3 = vsub.f32 0.0, %v416_v63  ;;  %v636_v4 = vsel %vm423_vm7, 1.0, %v999_v1  ;;  %s267_s28 = scalar_lea.vmem [#allocation6], %s626_s5  ;;  %s1341_s26 = sshll.u32 %s1210_s10, 7 }
 0x143   : > { %v405_v8 = vadd.f32 1.0, %v404_v2  ;;  %s477_s8 = sshll.u32 %s267_s28, 4  ;;  %s1261_s30 = scalar_lea.hbm %s1328_s4, %s1341_s26  ;;  %s1263_s8 = int_to_ptr.vmem [resolvable:$true] %s477_s8 }
 0x144   : > { %v422_v5 = vsel %vm417_vm6, %v421_v3, %v416_v63  ;;  %v426_v6 = vadd.f32 %v636_v4, %v420_v0  ;;  %s447_s29 = scalar_lea.sflag [#allocation7], %s1205_s18  ;;  %s865_s22 = scalar_lea.vmem %s1263_s8, 128 }
 0x145   : > { %v427_v7 = vsub.f32 0.0, %v422_v5  ;;  %p866_p1 = scmp.ne.s32.totalorder %s1263_s8, %s865_s22  ;;  %s1003_s5 = smov [#allocation6]  }
 0x146   : > { %v430_v11 = vmul.f32 2.0, %v426_v6  ;;  %s869_s21 = sshll.u32 %s1003_s5, 4  ;;  %s870_s21 = int_to_ptr.vmem [resolvable:$false] %s869_s21 }
 0x147   : > { %v428_v9 = vsel %vm423_vm7, %v427_v7, %v422_v5  ;;  %p867_p5 = pnand %p866_p1, %p1340_p2  ;;  %s871_s10 = scalar_lea.vmem %s870_s21, 256 }
 0x148   : > { %v429_v10 = vmul.f32 %v428_v9, %v405_v8  ;;  %p872_p3 = scmp.lt.s32.totalorder %s1263_s8, %s870_s21  ;;  %p873_p10 = scmp.lt.s32.totalorder %s871_s10, %s865_s22 }
 0x149   : > { %p868_p7 = pneg %p867_p5 }
 0x14a   : > { %v431_v12 = vsub.f32 %v429_v10, %v430_v11  ;;  %p874_p11 = por %p873_p10, %p872_p3 }
 0x14c   : > { %v439_v13 = vmul.f32 %v435_v51, %v431_v12  ;;  %p875_p6 = pnand %p874_p11, %p868_p7 }
 0x14e   : > { %440 = vst [vmem:[%s267_s28] sm:$0xff] %v439_v13 }
 0x14f   : > { %878 = shalt.err (!%p875_p6)
}
 0x150   : > { %s879_s18 = scalar_lea.hbm %s1261_s30, 128  ;;  %s883_s28 = scalar_lea.hbm %s1328_s4, 512 }
 0x151   : > { %p880_p9 = scmp.ne.s32.totalorder %s1261_s30, %s879_s18  ;;  %p884_p8 = scmp.lt.u32.totalorder %s1261_s30, %s1328_s4 }
 0x152   : > { %p885_p4 = scmp.lt.u32.totalorder %s883_s28, %s879_s18  ;;  %p887_p1 = scmp.lt.u32.totalorder %s879_s18, %s1261_s30 }
 0x153   : > { %p881_p12 = pnand %p880_p9, %p1340_p2 }
 0x154   : > { %p886_p0 = por %p885_p4, %p884_p8 }
 0x155   : > { %p882_p13 = pneg %p881_p12 }
 0x156   : > { %p888_p5 = por %p887_p1, %p886_p0 }
 0x158   : > { %p889_p7 = pnand %p888_p5, %p882_p13 }
 0x15a   : > { %892 = shalt.err (!%p889_p7)
}
 0x15b   : > { %688 = dma.vmem_to_hbm [thread:$0]  (%p1340_p2), %s1263_s8, 128, %s1261_s30, %s447_s29  }
 0x15c PF: > { %p703_p3 = scmp.ge.s32.totalorder %s991_s25, 2  ;;  %s489_s9 = sand.u32 1, %s951_s15  }
 0x15d   : > { %p1342_p10 = scmp.ne.s32.totalorder %s1338_s14, 0  ;;  %s490_s22 = scalar_lea.sflag [#allocation4], %s489_s9 }
 0x15f   : > { %p696_p11 = pnand %p703_p3, %p1342_p10 }
 0x161   : > { %942 = dma.done.wait (!%p696_p11), %s490_s22, 128  }
 0x162   : > { %944 = vsyncadd (!%p696_p11), %s490_s22, 4294967168  ;;  %s499_s5 = scalar_lea.sflag [#allocation7], %s489_s9 }
 0x163   : > { %946 = dma.done.wait (!%p696_p11), %s499_s5, 128  }
 0x164   : > { %948 = vsyncadd (!%p696_p11), %s499_s5, 4294967168  ;;  %s24_s25 = sadd.s32 1, %s991_s25   ;;  %s1343_s13 = sld [smem:[#allocation11_spill]] }
 0x165   : > { %p21_p6 = scmp.ge.s32.totalorder %s24_s25, 6   ;;  %s1344_s14 = sld [smem:[#allocation12_spill]] }
 0x166   : > { %s1345_s15 = smov %s955_s16  ;;  %s1346_s16 = smov %s959_s17 }
 0x167   : > { %s1347_s17 = smov %s1117_s12  ;;  %s1348_s18 = smov %s967_s19 }
 0x168   : > { %s1349_s19 = smov %s971_s20  ;;  %s1350_s20 = smov %s1103_s7 }
 0x169   : > { %s1351_s21 = smov %s983_s23  ;;  %s1352_s22 = smov %s987_s24 }
 0x16a   : > { %s1353_s23 = smov %s1343_s13  ;;  %23 = sbr.rel (!%p21_p6) target bundleno = 11 (0xb), region = 100 }
 0x16b   : > { %s1354_s24 = smov %s1344_s14 }
 0x171   :  { %504 = vsyncpa [#allocation3], 1 }
 0x172   :  { %506 = vsyncpa [#allocation3 + $0x1], 1 }
 0x173   :  { %507 = vsyncpa [#allocation4], 1 }
 0x174   :  { %509 = vsyncpa [#allocation4 + $0x1], 1 }
 0x175   :  { %510 = vsyncpa [#allocation7], 1 }
 0x176   :  { %512 = vsyncpa [#allocation7 + $0x1], 1 }

</bundles_post_ra>
